<compile_context>
chip_gen: v7x
topology: tpu7x:2x2x1
jax: 0.10.0
libtpu: 0.0.40
codegen_flags: <defaults>
</compile_context>

<pallas_src>
import functools

import jax
import jax.numpy as jnp
from jax.experimental import pallas as pl
from jax.experimental.pallas import tpu as pltpu


def _energy_loss_kernel(pred_ref, targ_ref, out_ref, acc_ref, *,
                        epsilon, inv_denom, tm, tiles_per_core, total_rows):
    c = pl.program_id(0)   # core axis (parallel on v7x)
    i = pl.program_id(1)   # reduction over row tiles (per core)

    @pl.when(i == 0)
    def _():
        acc_ref[...] = jnp.zeros_like(acc_ref)

    p = pred_ref[...].astype(jnp.float32)          # (tm, T)
    t = targ_ref[...].astype(jnp.float32)          # (tm, T)

    diff = p - t
    sse = jnp.sum(diff * diff, axis=-1, keepdims=True)      # (tm, 1)
    energy = jnp.sum(t * t, axis=-1, keepdims=True)         # (tm, 1)

    # Exact reciprocal (approx=False): keeps tight tolerances; kernel is
    # DMA-bound so the extra EUP/VALU cost is hidden anyway.
    wsse = sse * pl.reciprocal(energy + epsilon)

    # Ragged-tail handling without any host-side padding: mask rows that lie
    # beyond the real M (covers the partial last tile AND fully-clamped tiles).
    row_start = (c * tiles_per_core + i) * tm
    row_ids = row_start + jax.lax.broadcasted_iota(jnp.int32, (tm, 1), 0)
    wsse = jnp.where(row_ids < total_rows, wsse, 0.0)

    acc_ref[...] += wsse

    @pl.when(i == tiles_per_core - 1)
    def _():
        # One cross-sublane reduce per core, only on the final step.
        out_ref[...] = jnp.sum(acc_ref[...], keepdims=True) * inv_denom


def _detect_num_tensorcores():
    # 2-way TensorCore split only pays on v7x (2 TCs/chip); v5e/v6e have 1.
    try:
        kind = jax.devices()[0].device_kind.lower()
    except Exception:
        return 1
    return 2 if "v7" in kind else 1


def _vmem_budget():
    # Generation-aware VMEM sizing: 64 MiB/TC on v7x, 128 MiB on v5e/v6e.
    try:
        cap = int(pltpu.get_tpu_info().vmem_capacity_bytes)
    except Exception:
        cap = 64 * 1024 * 1024  # conservative (v7x per-TC)
    limit = min((cap * 3) // 4, 96 * 1024 * 1024)   # scoped limit we request
    budget = limit // 2                             # working-set budget
    return budget, limit


def _choose_tm(M, T, pred_itemsize, targ_itemsize, budget_bytes, num_cores):
    # Sublane alignment follows the tighter packing (8 f32 / 16 bf16 / 32 int8).
    min_item = max(1, min(pred_itemsize, targ_itemsize))
    sub = 8 * max(1, 4 // min_item)

    # 2 pipeline buffers per input + the lane-padded (tm,1)->(tm,128) f32 acc.
    bytes_per_row = 2 * T * (pred_itemsize + targ_itemsize) + 512
    tm = budget_bytes // bytes_per_row
    # Keep each input block <= ~8 MiB (amortizes per-step overhead, near roofline).
    tm = min(tm, (8 * 1024 * 1024) // max(1, T * max(pred_itemsize, targ_itemsize)))
    tm = max(sub, (tm // sub) * sub)

    rows_per_core = -(-M // num_cores)
    if rows_per_core < tm:
        tm = max(sub, ((rows_per_core + sub - 1) // sub) * sub)
        if tm > M:
            tm = M   # a block equal to the full row dim is always layout-legal
    return int(tm)


def energy_based_loss(predictions, targets, epsilon=1e-6, *,
                      num_cores=None, tile_rows=None):
    """predictions, targets: (B, N, T). Returns scalar float32 loss."""
    assert predictions.shape == targets.shape
    B, N, T = predictions.shape
    M = B * N

    pred2 = predictions.reshape(M, T)
    targ2 = targets.reshape(M, T)
    pred_item = jnp.dtype(pred2.dtype).itemsize
    targ_item = jnp.dtype(targ2.dtype).itemsize

    if num_cores is None:
        num_cores = _detect_num_tensorcores()
    budget, vmem_limit = _vmem_budget()

    if tile_rows is not None:
        tm = int(tile_rows)
    else:
        tm = _choose_tm(M, T, pred_item, targ_item, budget, num_cores)

    tiles_total = -(-M // tm)
    num_cores = max(1, min(num_cores, tiles_total))
    tiles_per_core = -(-tiles_total // num_cores)

    # Clamp the row-tile index so over-rounded (core, i) steps re-read the last
    # valid tile instead of DMAing out of bounds; the kernel's row-id mask
    # zeroes their contribution.
    def in_map(c, i):
        return (jnp.minimum(c * tiles_per_core + i, tiles_total - 1), 0)

    kernel = functools.partial(
        _energy_loss_kernel,
        epsilon=float(epsilon),
        inv_denom=float(1.0 / (M * T)),   # fold the 1/T of the mean + 1/M here
        tm=tm,
        tiles_per_core=int(tiles_per_core),
        total_rows=int(M),
    )

    cost = pl.CostEstimate(
        flops=5 * M * T,
        transcendentals=0,
        bytes_accessed=M * T * (pred_item + targ_item) + 4 * num_cores,
    )

    def launch(core_sem):
        return pl.pallas_call(
            kernel,
            out_shape=jax.ShapeDtypeStruct((num_cores, 1), jnp.float32),
            grid_spec=pltpu.PrefetchScalarGridSpec(
                num_scalar_prefetch=0,
                grid=(num_cores, int(tiles_per_core)),
                in_specs=[
                    pl.BlockSpec((tm, T), in_map),
                    pl.BlockSpec((tm, T), in_map),
                ],
                out_specs=pl.BlockSpec((1, 1), lambda c, i: (c, 0)),
                scratch_shapes=[pltpu.VMEM((tm, 1), jnp.float32)],
            ),
            compiler_params=pltpu.CompilerParams(
                dimension_semantics=(core_sem, pltpu.ARBITRARY),
                vmem_limit_bytes=int(vmem_limit),
            ),
            cost_estimate=cost,
        )(pred2, targ2)

    if num_cores > 1:
        # v7x: ask for a real per-TensorCore split; fall back if rejected.
        try:
            partials = launch(pltpu.CORE_PARALLEL)
        except Exception:
            partials = launch(pltpu.PARALLEL)
    else:
        partials = launch(pltpu.ARBITRARY)

    return jnp.sum(partials)


def _reference_loss(predictions, targets, epsilon=1e-6):
    mse_loss = jnp.mean((predictions - targets) ** 2, axis=-1)
    energies = jnp.sum(targets ** 2, axis=-1)
    weights = 1.0 / (energies + epsilon)
    return jnp.mean(weights * mse_loss)


if __name__ == "__main__":
    key = jax.random.PRNGKey(0)
    k1, k2, k3, k4 = jax.random.split(key, 4)

    # Test 1: small aligned case (B, N, T) = (2, 4, 128).
    B, N, T = 2, 4, 128
    predictions = jax.random.normal(k1, (B, N, T), dtype=jnp.float32)
    targets = jax.random.normal(k2, (B, N, T), dtype=jnp.float32)

    loss = energy_based_loss(predictions, targets)
    loss = jax.block_until_ready(loss)
    ref = _reference_loss(predictions, targets)
    assert jnp.allclose(loss, ref, rtol=1e-5, atol=1e-6), (loss, ref)

    # Test 2: ragged rows (M=20 not a multiple of the 8-row tile) exercises the
    # no-pad in-kernel masking path across multiple tiles.
    B2, N2, T2 = 4, 5, 256
    predictions2 = jax.random.normal(k3, (B2, N2, T2), dtype=jnp.float32)
    targets2 = jax.random.normal(k4, (B2, N2, T2), dtype=jnp.float32)

    loss2 = energy_based_loss(predictions2, targets2, tile_rows=8)
    loss2 = jax.block_until_ready(loss2)
    ref2 = _reference_loss(predictions2, targets2)
    assert jnp.allclose(loss2, ref2, rtol=1e-5, atol=1e-6), (loss2, ref2)

    print("KERNEL_OK")
</pallas_src>

<mosaic_0001>
module attributes {stable_mosaic.version = 11 : i64} {
  func.func @_energy_loss_kernel(%arg0: i32, %arg1: i32, %arg2: memref<8x128xf32, #tpu.memory_space<vmem>>, %arg3: memref<8x128xf32, #tpu.memory_space<vmem>>, %arg4: memref<1x1xf32, #tpu.memory_space<vmem>>, %arg5: memref<8x1xf32, #tpu.memory_space<vmem>>) attributes {dimension_semantics = [#tpu.dimension_semantics<arbitrary>, #tpu.dimension_semantics<arbitrary>], iteration_bounds = array<i64: 1, 1>, scalar_prefetch = 0 : i64, scratch_operands = 1 : i64, tpu.core_type = #tpu.core_type<tc>, window_params = [{transform_indices = @transform_0, window_bounds = array<i64: 8, 128>}, {transform_indices = @transform_1, window_bounds = array<i64: 8, 128>}, {transform_indices = @transform_2, window_bounds = array<i64: 1, 1>}]} {
    %c0_i32 = arith.constant 0 : i32
    %0 = arith.cmpi eq, %arg1, %c0_i32 : i32
    %1 = arith.extui %0 : i1 to i32
    %c0_i32_0 = arith.constant 0 : i32
    %2 = arith.cmpi ne, %1, %c0_i32_0 : i32
    scf.if %2 {
      %cst_14 = arith.constant 0.000000e+00 : f32
      %32 = vector.broadcast %cst_14 : f32 to vector<8x1xf32>
      %c0_15 = arith.constant 0 : index
      %c0_16 = arith.constant 0 : index
      %33 = vector.load %arg5[%c0_15, %c0_16] : memref<8x1xf32, #tpu.memory_space<vmem>>, vector<8x1xf32>
      tpu.vector_store %arg5[%c0_15, %c0_16], %32 {strides = array<i32>} : memref<8x1xf32, #tpu.memory_space<vmem>>, vector<8x1xf32>,
    } else {
    }
    %c0 = arith.constant 0 : index
    %c0_1 = arith.constant 0 : index
    %3 = vector.load %arg2[%c0, %c0_1] : memref<8x128xf32, #tpu.memory_space<vmem>>, vector<8x128xf32>
    %c0_2 = arith.constant 0 : index
    %c0_3 = arith.constant 0 : index
    %4 = vector.load %arg3[%c0_2, %c0_3] : memref<8x128xf32, #tpu.memory_space<vmem>>, vector<8x128xf32>
    %5 = arith.subf %3, %4 : vector<8x128xf32>
    %6 = arith.mulf %5, %5 : vector<8x128xf32>
    %cst = arith.constant dense<0.000000e+00> : vector<8xf32>
    %7 = vector.multi_reduction <add>, %6, %cst [1] : vector<8x128xf32> to vector<8xf32>
    %8 = vector.shape_cast %7 : vector<8xf32> to vector<8x1xf32>
    %9 = arith.mulf %4, %4 : vector<8x128xf32>
    %cst_4 = arith.constant dense<0.000000e+00> : vector<8xf32>
    %10 = vector.multi_reduction <add>, %9, %cst_4 [1] : vector<8x128xf32> to vector<8xf32>
    %11 = vector.shape_cast %10 : vector<8xf32> to vector<8x1xf32>
    %cst_5 = arith.constant 9.99999997E-7 : f32
    %12 = vector.broadcast %cst_5 : f32 to vector<8x1xf32>
    %13 = arith.addf %11, %12 : vector<8x1xf32>
    %14 = tpu.reciprocal %13 : vector<8x1xf32> -> vector<8x1xf32>
    %15 = arith.mulf %8, %14 : vector<8x1xf32>
    %c1_i32 = arith.constant 1 : i32
    %16 = arith.muli %arg0, %c1_i32 : i32
    %17 = arith.addi %16, %arg1 : i32
    %c8_i32 = arith.constant 8 : i32
    %18 = arith.muli %17, %c8_i32 : i32
    %19 = tpu.iota {dimensions = array<i32: 0>} : vector<8x1xi32>
    %20 = vector.broadcast %18 : i32 to vector<8x1xi32>
    %21 = arith.addi %20, %19 : vector<8x1xi32>
    %c8_i32_6 = arith.constant 8 : i32
    %22 = vector.broadcast %c8_i32_6 : i32 to vector<8x1xi32>
    %23 = arith.cmpi slt, %21, %22 : vector<8x1xi32>
    %cst_7 = arith.constant 0.000000e+00 : f32
    %24 = vector.broadcast %cst_7 : f32 to vector<8x1xf32>
    %25 = arith.select %23, %15, %24 : vector<8x1xi1>, vector<8x1xf32>
    %c0_8 = arith.constant 0 : index
    %c0_9 = arith.constant 0 : index
    %26 = vector.load %arg5[%c0_8, %c0_9] : memref<8x1xf32, #tpu.memory_space<vmem>>, vector<8x1xf32>
    %27 = arith.addf %26, %25 : vector<8x1xf32>
    %c0_10 = arith.constant 0 : index
    %c0_11 = arith.constant 0 : index
    %28 = vector.load %arg5[%c0_10, %c0_11] : memref<8x1xf32, #tpu.memory_space<vmem>>, vector<8x1xf32>
    tpu.vector_store %arg5[%c0_10, %c0_11], %27 {strides = array<i32>} : memref<8x1xf32, #tpu.memory_space<vmem>>, vector<8x1xf32>,
    %c0_i32_12 = arith.constant 0 : i32
    %29 = arith.cmpi eq, %arg1, %c0_i32_12 : i32
    %30 = arith.extui %29 : i1 to i32
    %c0_i32_13 = arith.constant 0 : i32
    %31 = arith.cmpi ne, %30, %c0_i32_13 : i32
    scf.if %31 {
      %c0_14 = arith.constant 0 : index
      %c0_15 = arith.constant 0 : index
      %32 = vector.load %arg5[%c0_14, %c0_15] : memref<8x1xf32, #tpu.memory_space<vmem>>, vector<8x1xf32>
      %33 = vector.shape_cast %32 : vector<8x1xf32> to vector<1x8x1xf32>
      %cst_16 = arith.constant dense<0.000000e+00> : vector<1xf32>
      %34 = vector.multi_reduction <add>, %33, %cst_16 [1, 2] : vector<1x8x1xf32> to vector<1xf32>
      %35 = vector.shape_cast %34 : vector<1xf32> to vector<1x1x1xf32>
      %36 = vector.extract %35[0, 0, 0] : f32 from vector<1x1x1xf32>
      %37 = vector.broadcast %36 : f32 to vector<1x1xf32>
      %cst_17 = arith.constant 9.765625E-4 : f32
      %38 = vector.broadcast %cst_17 : f32 to vector<1x1xf32>
      %39 = arith.mulf %37, %38 : vector<1x1xf32>
      %c0_18 = arith.constant 0 : index
      %c0_19 = arith.constant 0 : index
      %40 = vector.load %arg4[%c0_18, %c0_19] : memref<1x1xf32, #tpu.memory_space<vmem>>, vector<1x1xf32>
      tpu.vector_store %arg4[%c0_18, %c0_19], %39 {strides = array<i32>} : memref<1x1xf32, #tpu.memory_space<vmem>>, vector<1x1xf32>,
    } else {
    }
    return
  }
  func.func @transform_0(%arg0: i32, %arg1: i32) -> (i32, i32) {
    %c1_i32 = arith.constant 1 : i32
    %0 = arith.muli %arg0, %c1_i32 : i32
    %1 = arith.addi %0, %arg1 : i32
    %c0_i32 = arith.constant 0 : i32
    %2 = arith.minsi %1, %c0_i32 : i32
    %c0_i32_0 = arith.constant 0 : i32
    %c0_i32_1 = arith.constant 0 : i32
    return %2, %c0_i32_0 : i32, i32
  }
  func.func @transform_1(%arg0: i32, %arg1: i32) -> (i32, i32) {
    %c1_i32 = arith.constant 1 : i32
    %0 = arith.muli %arg0, %c1_i32 : i32
    %1 = arith.addi %0, %arg1 : i32
    %c0_i32 = arith.constant 0 : i32
    %2 = arith.minsi %1, %c0_i32 : i32
    %c0_i32_0 = arith.constant 0 : i32
    %c0_i32_1 = arith.constant 0 : i32
    return %2, %c0_i32_0 : i32, i32
  }
  func.func @transform_2(%arg0: i32, %arg1: i32) -> (i32, i32) {
    %c0_i32 = arith.constant 0 : i32
    %c0_i32_0 = arith.constant 0 : i32
    return %arg0, %c0_i32 : i32, i32
  }
}

</mosaic_0001>

<bundles_post_ra>
// kernel: tpu_custom_call.1
= control target key start
LH: loop header
LB: loop body
LE: loop exit
PB: predicated region body
PF: predicated region fallthrough
CT: control target
= control target key end

     0   :  { %7 = vsyncpa [#allocation4], 0  ;;  %s255_s0 = inlined_call_operand.hbm [shape: f32[8,128], index: 0, kind: input, shape index: {}]   ;;  %s256_s1 = inlined_call_operand.hbm [shape: f32[8,128], index: 1, kind: input, shape index: {}]   ;;  %s257_s2 = inlined_call_operand.hbm [shape: f32[1,1], index: 2, kind: output, shape index: {}]  }
   0x1   :  { %8 = vsyncpa [#allocation7], 0 }
   0x2   :  { %9 = vsyncpa [#allocation5], 0  ;;  %s200_s9 = smov [#allocation3]   ;;  %s201_s11 = smov [#allocation6]  }
   0x3   :  { %s21_s10 = sshll.u32 %s200_s9, 4  ;;  %s36_s12 = sshll.u32 %s201_s11, 4  ;;  %s22_s10 = int_to_ptr.vmem [resolvable:$true] %s21_s10  ;;  %s37_s12 = int_to_ptr.vmem [resolvable:$true] %s36_s12 }
   0x4   :  { %s128_s15 = scalar_lea.hbm %s255_s0, 128 }
   0x5   :  { %p129_p0 = scmp.ne.s32.totalorder %s255_s0, %s128_s15  ;;  %p132_p1 = scmp.lt.u32.totalorder %s128_s15, %s255_s0 }
   0x7   :  { %p134_p2 = pnand %p132_p1, %p129_p0 }
   0x9   :  { %137 = shalt.err (!%p134_p2)
}
   0xa   :  { %s138_s20 = scalar_lea.vmem %s22_s10, 128  ;;  %p143_p4 = scmp.lt.s32.totalorder %s22_s10, %s22_s10 }
   0xb   :  { %p139_p3 = scmp.ne.s32.totalorder %s22_s10, %s138_s20  ;;  %p144_p5 = scmp.lt.s32.totalorder %s138_s20, %s138_s20 }
   0xd   :  { %p145_p6 = por %p144_p5, %p143_p4 }
   0xf   :  { %p146_p7 = pnand %p145_p6, %p139_p3 }
  0x11   :  { %149 = shalt.err (!%p146_p7)
}
  0x12   :  { %24 = dma.hbm_to_vmem [thread:$0]  %s255_s0, 128, %s22_s10, [#allocation4]  }
  0x13   :  { %s150_s25 = scalar_lea.hbm %s256_s1, 128 }
  0x14   :  { %p151_p8 = scmp.ne.s32.totalorder %s256_s1, %s150_s25  ;;  %p154_p9 = scmp.lt.u32.totalorder %s150_s25, %s256_s1 }
  0x16   :  { %p156_p10 = pnand %p154_p9, %p151_p8 }
  0x18   :  { %159 = shalt.err (!%p156_p10)
}
  0x19   :  { %s160_s30 = scalar_lea.vmem %s37_s12, 128  ;;  %p165_p12 = scmp.lt.s32.totalorder %s37_s12, %s37_s12 }
  0x1a   :  { %p161_p11 = scmp.ne.s32.totalorder %s37_s12, %s160_s30  ;;  %p166_p13 = scmp.lt.s32.totalorder %s160_s30, %s160_s30 }
  0x1c   :  { %p167_p0 = por %p166_p13, %p165_p12 }
  0x1e   :  { %p168_p1 = pnand %p167_p0, %p161_p11 }
  0x20   :  { %171 = shalt.err (!%p168_p1)
}
  0x21   :  { %39 = dma.hbm_to_vmem [thread:$0]  %s256_s1, 128, %s37_s12, [#allocation7]  }
  0x22   :  { %194 = dma.done.wait [#allocation4], 128  }
  0x23   :  { %195 = vsyncadd [#allocation4], 4294967168 }
  0x24   :  { %196 = dma.done.wait [#allocation7], 128  }
  0x25   :  { %197 = vsyncadd [#allocation7], 4294967168  ;;  %v59_v0 = vld [vmem:[#allocation6] sm:$0xff]  ;;  %v58_v1 = vld [vmem:[#allocation3] sm:$0xff]  ;;  %vm56_vm0 = vcmask 7168   ;;  %v202_v5 = vmov 0.0  }
  0x26   :  { %v64_v2 = vmul.f32 %v59_v0, %v59_v0  ;;  %v60_v3 = vsub.f32 %v58_v1, %v59_v0  ;;  %57 = vst.msk [vmem:[#allocation2] sm:$0xff] %vm56_vm0, %v202_v5  ;;  %s203_s1 = smov [#allocation8]   ;;  %vm98_vm1 = vcmask 0  }
  0x27   :  { %s106_s4 = sshll.u32 %s203_s1, 4  ;;  %s107_s4 = int_to_ptr.vmem [resolvable:$true] %s106_s4 }
  0x28   :  { %65 = vadd.xlane.f32.xlu0 %v64_v2  ;;  %v61_v4 = vmul.f32 %v60_v3, %v60_v3  ;;  %s172_s6 = scalar_lea.vmem %s107_s4, 16  ;;  %s176_s7 = scalar_lea.vmem %s107_s4, 32 }
  0x29   :  { %p173_p2 = scmp.ne.s32.totalorder %s107_s4, %s172_s6  ;;  %p177_p3 = scmp.lt.s32.totalorder %s107_s4, %s107_s4 }
  0x2a   :  { %p178_p4 = scmp.lt.s32.totalorder %s176_s7, %s172_s6 }
  0x2c   :  { %62 = vadd.xlane.f32.xlu0 %v61_v4  ;;  %p179_p5 = por %p178_p4, %p177_p3 }
  0x2d   :  { %v78_v10 = vld [vmem:[#allocation2] sm:$0xff] }
  0x2e   :  { %p180_p6 = pnand %p179_p5, %p173_p2 }
  0xb5   :  { %v66_v6 = vpop.xlane.xlu0 %65 }
  0xb6   :  { %v67_v7 = vadd.f32 1e-06, %v66_v6 }
  0xb8   :  { %126 = vrcp.f32 %v67_v7 }
  0xb9   :  { %v63_v8 = vpop.xlane.xlu0 %62 }
  0xc2   :  { %v127_v9 = vpop.eup %126 }
  0xc3   :  { %v69_v11 = vmul.f32 %v127_v9, %v63_v8 }
  0xc5   :  { %v79_v12 = vadd.f32 %v78_v10, %v69_v11 }
  0xc7   :  { %81 = vst.msk [vmem:[#allocation2] sm:$0xff] %vm56_vm0, %v79_v12 }
  0xce   :  { %v85_v13 = vld [vmem:[#allocation2] sm:$0xff] }
  0xcf   :  { %v86_v14 = vsel %vm56_vm0, %v85_v13, 0.0 }
  0xd0   :  { %87 = vadd.xlane.f32.xlu1 %v86_v14 }
 0x15d   :  { %v88_v15 = vpop.xlane.xlu1 %87 }
 0x15e   :  { %v89_v16 = vrot.slane %v88_v15, 4 }
 0x160   :  { %v90_v17 = vadd.f32 %v89_v16, %v88_v15 }
 0x162   :  { %v91_v18 = vrot.slane %v90_v17, 2 }
 0x164   :  { %v92_v19 = vadd.f32 %v91_v18, %v90_v17 }
 0x166   :  { %v93_v20 = vrot.slane %v92_v19, 1 }
 0x168   :  { %v94_v21 = vadd.f32 %v93_v20, %v92_v19 }
 0x16a   :  { %120 = vpush %v94_v21 }
 0x19b   :  { %s121_s5 = spop %120 }
 0x19c   :  { %v96_v22 = vstv %s121_s5 }
 0x19d   :  { %v97_v23 = vmul.f32 0.0009765625, %v96_v22 }
 0x19f   :  { %99 = vst.msk [vmem:[#allocation8] sm:$0x1] %vm98_vm1, %v97_v23 }
 0x1a0   :  { %183 = shalt.err (!%p180_p6)
}
 0x1a1   :  { %s184_s10 = scalar_lea.hbm %s257_s2, 16 }
 0x1a2   :  { %p185_p7 = scmp.ne.s32.totalorder %s257_s2, %s184_s10  ;;  %p188_p8 = scmp.lt.u32.totalorder %s184_s10, %s257_s2 }
 0x1a4   :  { %p190_p9 = pnand %p188_p8, %p185_p7 }
 0x1a6   :  { %193 = shalt.err (!%p190_p9)
}
 0x1a7   :  { %109 = dma.vmem_to_hbm [thread:$0]  %s107_s4, 16, %s257_s2, [#allocation5]  }
 0x1a8   :  { %198 = dma.done.wait [#allocation5], 16  }
 0x1a9   :  { %199 = vsyncadd [#allocation5], 4294967280 }
 0x1aa   :  { %113 = vsyncpa [#allocation4], 1 }
 0x1ab   :  { %114 = vsyncpa [#allocation7], 1 }
 0x1ac   :  { %115 = vsyncpa [#allocation5], 1 }

</bundles_post_ra>
